<compile_context>
chip_gen: v5e
topology: v5e:2x2
jax: 0.10.0
libtpu: 0.0.40
codegen_flags: <defaults>
</compile_context>

<pallas_src>
import functools

import jax
import jax.numpy as jnp
from jax.experimental import pallas as pl
from jax.experimental.pallas import tpu as pltpu

_MIB = 1024 * 1024


def _round_up(x, m):
    return ((x + m - 1) // m) * m


def _round_down(x, m):
    return (x // m) * m


def _sublane_multiple(dtype) -> int:
    itemsize = jnp.dtype(dtype).itemsize
    if itemsize >= 4:
        return 8
    if itemsize == 2:
        return 16
    return 32


def _target_tile_bytes() -> int:
    # v7x streams HBM ~2.5x faster, so the ~0.35us per-grid-step overhead is a
    # larger fraction of each step there; use bigger tiles.  2 MiB elsewhere
    # (in+out double-buffered = 8 MiB, fits v5e's 16 MiB default scoped VMEM).
    try:
        kind = jax.devices()[0].device_kind.lower()
    except Exception:
        kind = ""
    if "7" in kind:  # "TPU v7x" / "TPU7x"
        return 4 * _MIB
    return 2 * _MIB


def _bias_bic_kernel(params_ref, x_ref, o_ref, *, low, high, tile_c,
                     col_block_lo, mode):
    # params_ref: SMEM f32[2] = [alpha, beta]
    alpha = params_ref[0]
    beta = params_ref[1]

    xf = x_ref[...].astype(jnp.float32)
    affine = alpha * xf + beta

    if mode == "plain":
        # Every visited column lies inside [low, high): plain FMA store.
        o_ref[...] = affine.astype(o_ref.dtype)
        return

    col0 = (pl.program_id(1) + col_block_lo) * tile_c

    def _masked_store():
        cols = col0 + jax.lax.broadcasted_iota(jnp.int32, xf.shape, dimension=1)
        keep = (cols >= low) & (cols < high)
        o_ref[...] = jnp.where(keep, affine, xf).astype(o_ref.dtype)

    if mode == "masked":
        # Single column block straddling a range edge: always mask.
        _masked_store()
        return

    # mode == "mixed": interior column blocks skip iota/compare/select.
    interior = jnp.logical_and(col0 >= low, col0 + tile_c <= high)

    @pl.when(interior)
    def _():
        o_ref[...] = affine.astype(o_ref.dtype)

    @pl.when(jnp.logical_not(interior))
    def _():
        _masked_store()


def bias_layer_bic(x, alpha, beta, low_range, high_range, *, force_pallas=False):
    """BiasLayer_BIC.forward(x, low_range, high_range) in JAX/Pallas.

    Notes:
      * low_range / high_range must be static Python ints (per-BiC-stage
        constants), so masks and the restricted column grid constant-fold.
      * The Pallas path aliases x with the output (input_output_aliases).
        Donate x at the call site (jax.jit(..., donate_argnums=...)) so the
        untouched-column HBM traffic is actually skipped; without donation
        XLA inserts a full copy of x first (correct, just slower).
      * For small logits (< ~1 MiB) a pure-XLA path is used; it fuses into the
        producing matmul epilogue and beats a standalone kernel launch.
    """
    assert x.ndim == 2, "expected logits of shape (batch, num_classes)"
    assert isinstance(low_range, int) and isinstance(high_range, int), (
        "low_range/high_range must be static Python ints")

    B, C = x.shape
    low = max(0, min(int(low_range), C))
    high = max(0, min(int(high_range), C))

    alpha = jnp.asarray(alpha, dtype=jnp.float32).reshape(())
    beta = jnp.asarray(beta, dtype=jnp.float32).reshape(())

    if high <= low:
        # Empty slice -> identity (PyTorch returns x.clone()).
        return x

    itemsize = jnp.dtype(x.dtype).itemsize
    total_bytes = B * C * itemsize

    if (not force_pallas) and total_bytes < 1 * _MIB:
        # Small-logits fallback: fuses into the producer; no kernel launch.
        seg = alpha * x[:, low:high].astype(jnp.float32) + beta
        return x.at[:, low:high].set(seg.astype(x.dtype))

    sub = _sublane_multiple(x.dtype)
    target_tile_bytes = _target_tile_bytes()

    # ---- column window / tile -------------------------------------------
    full_row = (
        C % 128 != 0                     # ragged class dim: block must span it
        or C <= 2048                     # contiguous full-row DMA, fewer steps
        or (high - low) >= (3 * C) // 4  # range covers most of C anyway
    )
    if full_row:
        c_lo, c_hi, tc = 0, C, C
    else:
        # 128-lane-aligned window around [low, high); the tile must divide
        # both the window span and its start (block-index addressing).
        c_lo = _round_down(low, 128)
        c_hi = min(C, _round_up(high, 128))
        span = c_hi - c_lo
        tc = 128
        for cand in (2048, 1024, 512, 256):
            if cand <= span and span % cand == 0 and c_lo % cand == 0:
                tc = cand
                break
    col_block_lo = c_lo // tc
    n_col_blocks = (c_hi - c_lo) // tc

    # ---- row tile ----------------------------------------------------------
    rows_for_target = max(sub, target_tile_bytes // max(1, tc * itemsize))
    if B >= 2 * sub:
        # Keep >= 2 row blocks so the "parallel" row axis can feed both
        # TensorCores on v7x (harmless no-op on single-TC v5e/v6e).
        half = _round_up(pl.cdiv(B, 2), sub)
        rows_for_target = min(int(rows_for_target), half)
    if B <= rows_for_target:
        tb = B
    else:
        tb = max(sub, _round_down(int(rows_for_target), sub))
    n_row_blocks = pl.cdiv(B, tb)

    # ---- static mask mode ----------------------------------------------
    if c_lo >= low and c_hi <= high:
        mode = "plain"
    elif n_col_blocks == 1:
        mode = "masked"
    else:
        mode = "mixed"

    params = jnp.stack([alpha, beta])

    kernel = functools.partial(
        _bias_bic_kernel, low=low, high=high, tile_c=tc,
        col_block_lo=col_block_lo, mode=mode)

    block_spec = pl.BlockSpec((tb, tc), lambda i, j: (i, j + col_block_lo))

    tile_bytes = tb * tc * itemsize
    vmem_limit = None
    if 4 * tile_bytes > 12 * _MIB:   # would exceed v5e's 16 MiB default scope
        vmem_limit = 32 * _MIB       # <= physical VMEM on every generation

    return pl.pallas_call(
        kernel,
        out_shape=jax.ShapeDtypeStruct(x.shape, x.dtype),
        grid=(n_row_blocks, n_col_blocks),
        in_specs=[
            pl.BlockSpec(memory_space=pltpu.MemorySpace.SMEM),  # [alpha, beta]
            block_spec,                                         # x tiles
        ],
        out_specs=block_spec,
        input_output_aliases={1: 0},  # x aliases the output buffer
        compiler_params=pltpu.CompilerParams(
            dimension_semantics=("parallel", "parallel"),
            vmem_limit_bytes=vmem_limit),
    )(params, x)


if __name__ == "__main__":
    key = jax.random.PRNGKey(0)
    k1, k2, k3, k4 = jax.random.split(key, 4)

    def ref(x, a, b, lo, hi):
        seg = jnp.asarray(a, jnp.float32) * x[:, lo:hi].astype(jnp.float32) \
            + jnp.asarray(b, jnp.float32)
        return x.at[:, lo:hi].set(seg.astype(x.dtype))

    # --- Test 1: small f32 logits (typical module usage) + XLA fallback path.
    B, C = 2, 16
    x1 = jax.random.normal(k1, (B, C), dtype=jnp.float32)
    a1, b1 = jnp.float32(0.5), jnp.float32(0.25)
    lo1, hi1 = 8, 12
    r1 = ref(x1, a1, b1, lo1, hi1)

    out1 = jax.block_until_ready(bias_layer_bic(x1, a1, b1, lo1, hi1,
                                                force_pallas=True))
    assert jnp.allclose(out1, r1, atol=1e-6), "mismatch (f32 small, pallas)"

    out1b = jax.block_until_ready(bias_layer_bic(x1, a1, b1, lo1, hi1))
    assert jnp.allclose(out1b, r1, atol=1e-6), "mismatch (f32 small, fallback)"

    # --- Test 2: bf16, full-row mode, donated input (alias -> no copy).
    B2, C2 = 16, 640
    x2 = jax.random.normal(k2, (B2, C2), dtype=jnp.float32).astype(jnp.bfloat16)
    a2, b2 = jnp.float32(1.25), jnp.float32(-0.5)
    lo2, hi2 = 520, 600
    r2 = ref(x2, a2, b2, lo2, hi2)
    x2_low = jnp.array(x2[:, :lo2])    # saved before donation
    x2_high = jnp.array(x2[:, hi2:])

    fwd2 = jax.jit(
        functools.partial(bias_layer_bic, low_range=lo2, high_range=hi2,
                          force_pallas=True),
        donate_argnums=(0,))
    out2 = jax.block_until_ready(fwd2(x2, a2, b2))
    assert jnp.allclose(out2.astype(jnp.float32), r2.astype(jnp.float32),
                        atol=1e-2, rtol=1e-2), "mismatch (bf16 full-row)"
    assert jnp.array_equal(out2[:, :lo2], x2_low)
    assert jnp.array_equal(out2[:, hi2:], x2_high)

    # --- Test 3: bf16, C > 2048 -> restricted 128-aligned column window,
    #     >= 2 row blocks; untouched column blocks preserved via aliasing.
    B3, C3 = 64, 4096
    x3 = jax.random.normal(k3, (B3, C3), dtype=jnp.float32).astype(jnp.bfloat16)
    a3, b3 = jnp.float32(0.75), jnp.float32(0.125)
    lo3, hi3 = 2600, 2700
    r3 = ref(x3, a3, b3, lo3, hi3)
    out3 = jax.block_until_ready(bias_layer_bic(x3, a3, b3, lo3, hi3,
                                                force_pallas=True))
    assert jnp.allclose(out3.astype(jnp.float32), r3.astype(jnp.float32),
                        atol=1e-2, rtol=1e-2), "mismatch (bf16 window)"
    assert jnp.array_equal(out3[:, :2560], x3[:, :2560])
    assert jnp.array_equal(out3[:, 2816:], x3[:, 2816:])

    # --- Test 4: f32, multi-block column window with unaligned edges
    #     (exercises the pl.when interior/edge "mixed" path).
    B4, C4 = 16, 4096
    x4 = jax.random.normal(k4, (B4, C4), dtype=jnp.float32)
    a4, b4 = jnp.float32(-0.5), jnp.float32(2.0)
    lo4, hi4 = 2600, 3300
    r4 = ref(x4, a4, b4, lo4, hi4)
    out4 = jax.block_until_ready(bias_layer_bic(x4, a4, b4, lo4, hi4,
                                                force_pallas=True))
    assert jnp.allclose(out4, r4, atol=1e-6), "mismatch (f32 mixed)"
    assert jnp.array_equal(out4[:, :2560], x4[:, :2560])
    assert jnp.array_equal(out4[:, 3328:], x4[:, 3328:])

    print("KERNEL_OK")
</pallas_src>

<mosaic_0001>
module attributes {stable_mosaic.version = 11 : i64} {
  func.func @_bias_bic_kernel(%arg0: i32, %arg1: i32, %arg2: memref<2xf32, #tpu.memory_space<smem>>, %arg3: memref<2x16xf32, #tpu.memory_space<vmem>>, %arg4: memref<2x16xf32, #tpu.memory_space<vmem>>) attributes {dimension_semantics = [#tpu.dimension_semantics<parallel>, #tpu.dimension_semantics<parallel>], iteration_bounds = array<i64: 1, 1>, scalar_prefetch = 0 : i64, scratch_operands = 0 : i64, tpu.core_type = #tpu.core_type<tc>, window_params = [{transform_indices = @transform_0, window_bounds = array<i64: 2>}, {transform_indices = @transform_1, window_bounds = array<i64: 2, 16>}, {transform_indices = @transform_2, window_bounds = array<i64: 2, 16>}]} {
    %c0 = arith.constant 0 : index
    %0 = memref.load %arg2[%c0] : memref<2xf32, #tpu.memory_space<smem>>
    %c1 = arith.constant 1 : index
    %1 = memref.load %arg2[%c1] : memref<2xf32, #tpu.memory_space<smem>>
    %c0_0 = arith.constant 0 : index
    %c0_1 = arith.constant 0 : index
    %2 = vector.load %arg3[%c0_0, %c0_1] : memref<2x16xf32, #tpu.memory_space<vmem>>, vector<2x16xf32>
    %3 = vector.broadcast %0 : f32 to vector<2x16xf32>
    %4 = arith.mulf %3, %2 : vector<2x16xf32>
    %5 = vector.broadcast %1 : f32 to vector<2x16xf32>
    %6 = arith.addf %4, %5 : vector<2x16xf32>
    %c0_i32 = arith.constant 0 : i32
    %7 = arith.addi %arg1, %c0_i32 : i32
    %c16_i32 = arith.constant 16 : i32
    %8 = arith.muli %7, %c16_i32 : i32
    %9 = tpu.iota {dimensions = array<i32: 1>} : vector<2x16xi32>
    %10 = vector.broadcast %8 : i32 to vector<2x16xi32>
    %11 = arith.addi %10, %9 : vector<2x16xi32>
    %c8_i32 = arith.constant 8 : i32
    %12 = vector.broadcast %c8_i32 : i32 to vector<2x16xi32>
    %13 = arith.cmpi sge, %11, %12 : vector<2x16xi32>
    %c12_i32 = arith.constant 12 : i32
    %14 = vector.broadcast %c12_i32 : i32 to vector<2x16xi32>
    %15 = arith.cmpi slt, %11, %14 : vector<2x16xi32>
    %16 = arith.andi %13, %15 : vector<2x16xi1>
    %17 = arith.select %16, %6, %2 : vector<2x16xi1>, vector<2x16xf32>
    %c0_2 = arith.constant 0 : index
    %c0_3 = arith.constant 0 : index
    %18 = vector.load %arg4[%c0_2, %c0_3] : memref<2x16xf32, #tpu.memory_space<vmem>>, vector<2x16xf32>
    tpu.vector_store %arg4[%c0_2, %c0_3], %17 {strides = array<i32>} : memref<2x16xf32, #tpu.memory_space<vmem>>, vector<2x16xf32>,
    return
  }
  func.func @transform_0(%arg0: i32, %arg1: i32) -> i32 {
    %c0_i32 = arith.constant 0 : i32
    %c0_i32_0 = arith.constant 0 : i32
    return %c0_i32 : i32
  }
  func.func @transform_1(%arg0: i32, %arg1: i32) -> (i32, i32) {
    %c0_i32 = arith.constant 0 : i32
    %0 = arith.addi %arg1, %c0_i32 : i32
    %c0_i32_0 = arith.constant 0 : i32
    return %arg0, %0 : i32, i32
  }
  func.func @transform_2(%arg0: i32, %arg1: i32) -> (i32, i32) {
    %c0_i32 = arith.constant 0 : i32
    %0 = arith.addi %arg1, %c0_i32 : i32
    %c0_i32_0 = arith.constant 0 : i32
    return %arg0, %0 : i32, i32
  }
}

</mosaic_0001>

<bundles_post_ra>
// kernel: tpu_custom_call.1
= control target key start
LH: loop header
LB: loop body
LE: loop exit
PB: predicated region body
PF: predicated region fallthrough
CT: control target
= control target key end

     0   :  { %7 = vsyncpa [#allocation5], 0  ;;  %s172_s0 = inlined_call_operand.vmem [shape: f32[2], index: 0, kind: input, shape index: {}]   ;;  %s173_s1 = inlined_call_operand.hbm [shape: f32[2,16], index: 1, kind: input, shape index: {}, may-alias: {1,2}]   ;;  %s174_s2 = inlined_call_operand.hbm [shape: f32[2,16], index: 2, kind: output, shape index: {}, may-alias: {1,2}]  }
   0x1   :  { %8 = vsyncpa [#allocation3], 0 }
   0x2   :  { %9 = vsyncpa [#allocation4], 0  ;;  %s15_s11 = sshll.u32 %s172_s0, 4  ;;  %s24_s14 = sshll.u32 %s173_s1, 4  ;;  %s16_s11 = int_to_ptr.vmem [resolvable:$true] %s15_s11  ;;  %s25_s14 = int_to_ptr.hbm [resolvable:$true] %s24_s14 }
   0x3   :  { %s145_s15 = smov [#allocation2]   ;;  %s146_s16 = smov [#allocation6]  }
   0x4   :  { %18 = dma.vmem_to_smem %s16_s11, 16, %s145_s15, [#allocation5]  }
   0x5   :  { %s26_s17 = sshll.u32 %s146_s16, 4  ;;  %s27_s17 = int_to_ptr.vmem [resolvable:$true] %s26_s17 }
   0x6   :  { %29 = dma.hbm_to_vmem [thread:$0]  %s25_s14, 32, %s27_s17, [#allocation3]  }
   0x7   :  { %139 = dma.done.wait [#allocation5], 16  }
   0x8   :  { %140 = vsyncadd [#allocation5], 4294967280 }
   0x9   :  { %141 = dma.done.wait [#allocation3], 32  }
   0xa   :  { %142 = vsyncadd [#allocation3], 4294967264 }
   0xb   :  { %38 = sfence }
   0xc   :  { %s39_s18 = sld [smem:[#allocation2]]  ;;  %v47_v0 = vlaneseq  ;;  %v41_v2 = vld [vmem:[#allocation6] sm:$0x3]  ;;  %s147_s1 = smov [#allocation7]   ;;  %vm55_vm3 = vcmask 123904  }
   0xd   :  { %s75_s0 = sld [smem:[#allocation2 + $0x1]]  ;;  %s62_s19 = sshll.u32 %s147_s1, 4  ;;  %s63_s19 = int_to_ptr.vmem [resolvable:$true] %s62_s19 }
   0xe   :  { %v48_v1 = vand.u32 127, %v47_v0  ;;  %s64_s22 = sshll.u32 %s174_s2, 4  ;;  %s65_s22 = int_to_ptr.hbm [resolvable:$true] %s64_s22 }
  0x10   :  { %vm51_vm0 = vcmp.ge.s32.totalorder %v48_v1, 8  ;;  %vm52_vm1 = vcmp.lt.s32.totalorder %v48_v1, 12 }
  0x11   :  { %vm53_vm2 = vmand %vm51_vm0, %vm52_vm1 }
  0x12   :  { %v42_v3 = vstv %s39_s18 }
  0x13   :  { %v43_v4 = vmul.f32 %v42_v3, %v41_v2  ;;  %v44_v5 = vstv %s75_s0 }
  0x15   :  { %v45_v6 = vadd.f32 %v44_v5, %v43_v4 }
  0x17   :  { %v54_v7 = vsel %vm53_vm2, %v45_v6, %v41_v2 }
  0x18   :  { %56 = vst.msk [vmem:[#allocation7] sm:$0x3] %vm55_vm3, %v54_v7 }
  0x19   :  { %67 = dma.vmem_to_hbm [thread:$0]  %s63_s19, 32, %s65_s22, [#allocation4]  }
  0x1a   :  { %143 = dma.done.wait [#allocation4], 32  }
  0x1b   :  { %144 = vsyncadd [#allocation4], 4294967264 }
  0x1c   :  { %72 = vsyncpa [#allocation3], 1 }
  0x1d   :  { %73 = vsyncpa [#allocation4], 1 }
  0x1e   :  { %74 = vsyncpa [#allocation5], 1 }

</bundles_post_ra>
